<compile_context>
chip_gen: v7x
topology: tpu7x:2x2x1
jax: 0.10.0
libtpu: 0.0.40
codegen_flags: <defaults>
</compile_context>

<pallas_src>
import functools

import jax
import jax.numpy as jnp
from jax.experimental import pallas as pl
from jax.experimental.pallas import tpu as pltpu


def _round_up(x, m):
    return (x + m - 1) // m * m


def _vae_kernel(
    x_ref, eps_ref,
    w_e1, b_e1, w_e2, b_e2,
    w_mulv, b_mulv,
    w_d1, b_d1, w_d2, b_d2, w_d3, b_d3,
    recon_ref, mulv_ref,
    *, latent_dim,
):
    cd = w_e1.dtype  # MXU compute dtype (bf16 or f32)

    def dense(act, w_ref, b_ref):
        # MXU matmul in the weight dtype, f32 accumulation, f32 bias add.
        return jnp.dot(act.astype(cd), w_ref[...],
                       preferred_element_type=jnp.float32) + b_ref[...]

    x = x_ref[...]                                   # (tb, input_dim)

    # ---------------- encoder ----------------
    h = jnp.maximum(dense(x, w_e1, b_e1), 0.0)
    h1 = jnp.maximum(dense(h, w_e2, b_e2), 0.0)

    # ---------------- fused mu | logvar ----------------
    y = dense(h1, w_mulv, b_mulv)                    # (tb, 2*latent), f32
    mulv_ref[...] = y.astype(mulv_ref.dtype)         # direct store, no padding
    mu = y[:, :latent_dim]
    logvar = y[:, latent_dim:]

    # ---------------- reparameterize (f32 VPU/EUP) ----------------
    std = jnp.exp(0.5 * logvar)
    z = mu + eps_ref[...] * std

    # ---------------- decoder ----------------
    d = jnp.maximum(dense(z, w_d1, b_d1), 0.0)
    d = jnp.maximum(dense(d, w_d2, b_d2), 0.0)
    recon_ref[...] = jax.nn.sigmoid(dense(d, w_d3, b_d3)).astype(recon_ref.dtype)


def vae_forward(x, eps, params, *, compute_dtype=jnp.bfloat16, max_tile_b=2048):
    """VAE forward pass in a single batch-tiled Pallas kernel.

    x:   (B, input_dim) f32
    eps: (B, latent_dim) f32 reparameterization noise (stand-in for randn_like)
    params: dict of pre-transposed (in, out) weights and (1, out) biases (f32).
    Returns (reconstructed_x, mu, logvar), all f32.
    """
    B, input_dim = x.shape
    latent_dim = eps.shape[1]
    cd = compute_dtype
    f32 = jnp.float32

    # Fuse mu / logvar projections; cast MXU operands to the compute dtype,
    # keep biases (added post-accumulation) in f32.
    w_mulv = jnp.concatenate([params["w_mu"], params["w_lv"]], axis=1).astype(cd)
    b_mulv = jnp.concatenate([params["b_mu"], params["b_lv"]], axis=1).astype(f32)
    weight_ops = (
        params["w_e1"].astype(cd), params["b_e1"].astype(f32),
        params["w_e2"].astype(cd), params["b_e2"].astype(f32),
        w_mulv, b_mulv,
        params["w_d1"].astype(cd), params["b_d1"].astype(f32),
        params["w_d2"].astype(cd), params["b_d2"].astype(f32),
        params["w_d3"].astype(cd), params["b_d3"].astype(f32),
    )

    # Batch tiling: 16-row multiples for bf16 (2 rows/sublane), 8 for f32.
    mult = 16 if cd == jnp.bfloat16 else 8
    tile_b = min(_round_up(max_tile_b, mult), _round_up(B, mult))
    b_pad = _round_up(B, tile_b)
    # Keep >= 2 grid steps for big batches (both v7x TensorCores get work;
    # one extra ~0.35 us pipeline step is negligible elsewhere).
    if b_pad // tile_b < 2 and B > 4 * mult:
        tile_b = max(mult, _round_up((b_pad + 1) // 2, mult))
        b_pad = _round_up(B, tile_b)
    if b_pad != B:
        x = jnp.pad(x, ((0, b_pad - B), (0, 0)))
        eps = jnp.pad(eps, ((0, b_pad - B), (0, 0)))
    x = x.astype(cd)        # feeds only the first matmul -> halves its DMA in bf16
    eps = eps.astype(f32)   # used in f32 elementwise math

    grid = (b_pad // tile_b,)

    def act_spec(dim):
        return pl.BlockSpec((tile_b, dim), lambda i: (i, 0))

    def resident_spec(arr):
        return pl.BlockSpec(arr.shape, lambda i: (0, 0))

    in_specs = ([act_spec(input_dim), act_spec(latent_dim)]
                + [resident_spec(a) for a in weight_ops])
    out_specs = [
        pl.BlockSpec((tile_b, input_dim), lambda i: (i, 0)),       # recon
        pl.BlockSpec((tile_b, 2 * latent_dim), lambda i: (i, 0)),  # mu|logvar
    ]
    out_shape = (
        jax.ShapeDtypeStruct((b_pad, input_dim), f32),
        jax.ShapeDtypeStruct((b_pad, 2 * latent_dim), f32),
    )

    # Advisory cost estimate for the XLA scheduler.
    flops = 2 * b_pad * (input_dim * 16 + 16 * 8 + 8 * (2 * latent_dim)
                         + latent_dim * 8 + 8 * 16 + 16 * input_dim)
    transcendentals = b_pad * (latent_dim + input_dim)   # exp + sigmoid
    bytes_accessed = (x.size * x.dtype.itemsize
                      + eps.size * eps.dtype.itemsize
                      + sum(a.size * a.dtype.itemsize for a in weight_ops)
                      + b_pad * (input_dim + 2 * latent_dim) * 4)

    kernel = functools.partial(_vae_kernel, latent_dim=latent_dim)

    recon, mulv = pl.pallas_call(
        kernel,
        out_shape=out_shape,
        grid_spec=pltpu.PrefetchScalarGridSpec(
            num_scalar_prefetch=0,
            grid=grid,
            in_specs=in_specs,
            out_specs=out_specs,
        ),
        compiler_params=pltpu.CompilerParams(
            dimension_semantics=("parallel",),
        ),
        cost_estimate=pl.CostEstimate(
            flops=flops,
            transcendentals=transcendentals,
            bytes_accessed=bytes_accessed,
        ),
    )(x, eps, *weight_ops)

    return (recon[:B],
            mulv[:B, :latent_dim],
            mulv[:B, latent_dim:])


# ----------------------------- reference & init -----------------------------

def _linear_params(key, in_dim, out_dim):
    """Deterministic init mimicking nn.Linear shapes; weight returned as (in, out)."""
    kw, kb = jax.random.split(key)
    bound = 1.0 / jnp.sqrt(in_dim)
    w = jax.random.uniform(kw, (in_dim, out_dim), jnp.float32, -bound, bound)
    b = jax.random.uniform(kb, (1, out_dim), jnp.float32, -bound, bound)
    return w, b


def make_params(key, input_dim, latent_dim):
    keys = jax.random.split(key, 7)
    p = {}
    p["w_e1"], p["b_e1"] = _linear_params(keys[0], input_dim, 16)
    p["w_e2"], p["b_e2"] = _linear_params(keys[1], 16, 8)
    p["w_mu"], p["b_mu"] = _linear_params(keys[2], 8, latent_dim)
    p["w_lv"], p["b_lv"] = _linear_params(keys[3], 8, latent_dim)
    p["w_d1"], p["b_d1"] = _linear_params(keys[4], latent_dim, 8)
    p["w_d2"], p["b_d2"] = _linear_params(keys[5], 8, 16)
    p["w_d3"], p["b_d3"] = _linear_params(keys[6], 16, input_dim)
    return p


def vae_forward_ref(x, eps, p, compute_dtype=jnp.float32):
    """Pure-JAX reference mirroring the kernel's dtype strategy."""
    cd, f32 = compute_dtype, jnp.float32

    def dense(a, w, b):
        return jnp.dot(a.astype(cd), w.astype(cd),
                       preferred_element_type=f32) + b.astype(f32)

    h = jnp.maximum(dense(x, p["w_e1"], p["b_e1"]), 0.0)
    h1 = jnp.maximum(dense(h, p["w_e2"], p["b_e2"]), 0.0)
    mu = dense(h1, p["w_mu"], p["b_mu"])
    logvar = dense(h1, p["w_lv"], p["b_lv"])
    z = mu + eps * jnp.exp(0.5 * logvar)
    d = jnp.maximum(dense(z, p["w_d1"], p["b_d1"]), 0.0)
    d = jnp.maximum(dense(d, p["w_d2"], p["b_d2"]), 0.0)
    recon = jax.nn.sigmoid(dense(d, p["w_d3"], p["b_d3"]))
    return recon, mu, logvar


if __name__ == "__main__":
    INPUT_DIM = 32   # stand-in for X_train.shape[1]
    LATENT_DIM = 8
    BATCH = 8

    key = jax.random.PRNGKey(0)
    k_x, k_eps, k_params = jax.random.split(key, 3)

    x = jax.random.normal(k_x, (BATCH, INPUT_DIM), jnp.float32)
    eps = jax.random.normal(k_eps, (BATCH, LATENT_DIM), jnp.float32)
    params = make_params(k_params, INPUT_DIM, LATENT_DIM)

    # --- f32 MXU path: tight check against the pure-f32 reference ---
    fwd_f32 = jax.jit(functools.partial(vae_forward, compute_dtype=jnp.float32))
    recon, mu, logvar = jax.block_until_ready(fwd_f32(x, eps, params))
    recon_r, mu_r, logvar_r = vae_forward_ref(x, eps, params, jnp.float32)
    assert recon.shape == (BATCH, INPUT_DIM)
    assert mu.shape == (BATCH, LATENT_DIM)
    assert logvar.shape == (BATCH, LATENT_DIM)
    assert jnp.allclose(recon, recon_r, atol=1e-5)
    assert jnp.allclose(mu, mu_r, atol=1e-5)
    assert jnp.allclose(logvar, logvar_r, atol=1e-5)

    # --- bf16 MXU path (default): check against a dtype-matched reference ---
    fwd_bf16 = jax.jit(functools.partial(vae_forward, compute_dtype=jnp.bfloat16))
    recon_b, mu_b, logvar_b = jax.block_until_ready(fwd_bf16(x, eps, params))
    recon_br, mu_br, logvar_br = vae_forward_ref(x, eps, params, jnp.bfloat16)
    assert jnp.allclose(recon_b, recon_br, atol=1e-2)
    assert jnp.allclose(mu_b, mu_br, atol=2e-2)
    assert jnp.allclose(logvar_b, logvar_br, atol=2e-2)

    # --- larger ragged batch: exercises batch padding + a multi-step grid ---
    B2 = 600
    k_x2, k_e2 = jax.random.split(jax.random.PRNGKey(1))
    x2 = jax.random.normal(k_x2, (B2, INPUT_DIM), jnp.float32)
    eps2 = jax.random.normal(k_e2, (B2, LATENT_DIM), jnp.float32)
    fwd_big = jax.jit(functools.partial(vae_forward,
                                        compute_dtype=jnp.bfloat16,
                                        max_tile_b=256))
    recon2, mu2, logvar2 = jax.block_until_ready(fwd_big(x2, eps2, params))
    recon2_r, mu2_r, logvar2_r = vae_forward_ref(x2, eps2, params, jnp.bfloat16)
    assert recon2.shape == (B2, INPUT_DIM)
    assert jnp.allclose(recon2, recon2_r, atol=1e-2)
    assert jnp.allclose(mu2, mu2_r, atol=2e-2)
    assert jnp.allclose(logvar2, logvar2_r, atol=2e-2)

    print("KERNEL_OK")
</pallas_src>

<mosaic_0001>
module attributes {stable_mosaic.version = 11 : i64} {
  func.func @_vae_kernel(%arg0: i32, %arg1: memref<8x32xf32, #tpu.memory_space<vmem>>, %arg2: memref<8x8xf32, #tpu.memory_space<vmem>>, %arg3: memref<32x16xf32, #tpu.memory_space<vmem>>, %arg4: memref<1x16xf32, #tpu.memory_space<vmem>>, %arg5: memref<16x8xf32, #tpu.memory_space<vmem>>, %arg6: memref<1x8xf32, #tpu.memory_space<vmem>>, %arg7: memref<8x16xf32, #tpu.memory_space<vmem>>, %arg8: memref<1x16xf32, #tpu.memory_space<vmem>>, %arg9: memref<8x8xf32, #tpu.memory_space<vmem>>, %arg10: memref<1x8xf32, #tpu.memory_space<vmem>>, %arg11: memref<8x16xf32, #tpu.memory_space<vmem>>, %arg12: memref<1x16xf32, #tpu.memory_space<vmem>>, %arg13: memref<16x32xf32, #tpu.memory_space<vmem>>, %arg14: memref<1x32xf32, #tpu.memory_space<vmem>>, %arg15: memref<8x32xf32, #tpu.memory_space<vmem>>, %arg16: memref<8x16xf32, #tpu.memory_space<vmem>>) attributes {dimension_semantics = [#tpu.dimension_semantics<parallel>], iteration_bounds = array<i64: 1>, scalar_prefetch = 0 : i64, scratch_operands = 0 : i64, tpu.core_type = #tpu.core_type<tc>, window_params = [{transform_indices = @transform_0, window_bounds = array<i64: 8, 32>}, {transform_indices = @transform_1, window_bounds = array<i64: 8, 8>}, {pipeline_mode = #tpu.pipeline_mode<synchronous>, transform_indices = @transform_2, window_bounds = array<i64: 32, 16>}, {pipeline_mode = #tpu.pipeline_mode<synchronous>, transform_indices = @transform_3, window_bounds = array<i64: 1, 16>}, {pipeline_mode = #tpu.pipeline_mode<synchronous>, transform_indices = @transform_4, window_bounds = array<i64: 16, 8>}, {pipeline_mode = #tpu.pipeline_mode<synchronous>, transform_indices = @transform_5, window_bounds = array<i64: 1, 8>}, {pipeline_mode = #tpu.pipeline_mode<synchronous>, transform_indices = @transform_6, window_bounds = array<i64: 8, 16>}, {pipeline_mode = #tpu.pipeline_mode<synchronous>, transform_indices = @transform_7, window_bounds = array<i64: 1, 16>}, {pipeline_mode = #tpu.pipeline_mode<synchronous>, transform_indices = @transform_8, window_bounds = array<i64: 8, 8>}, {pipeline_mode = #tpu.pipeline_mode<synchronous>, transform_indices = @transform_9, window_bounds = array<i64: 1, 8>}, {pipeline_mode = #tpu.pipeline_mode<synchronous>, transform_indices = @transform_10, window_bounds = array<i64: 8, 16>}, {pipeline_mode = #tpu.pipeline_mode<synchronous>, transform_indices = @transform_11, window_bounds = array<i64: 1, 16>}, {pipeline_mode = #tpu.pipeline_mode<synchronous>, transform_indices = @transform_12, window_bounds = array<i64: 16, 32>}, {pipeline_mode = #tpu.pipeline_mode<synchronous>, transform_indices = @transform_13, window_bounds = array<i64: 1, 32>}, {transform_indices = @transform_14, window_bounds = array<i64: 8, 32>}, {transform_indices = @transform_15, window_bounds = array<i64: 8, 16>}]} {
    %c0 = arith.constant 0 : index
    %c0_0 = arith.constant 0 : index
    %0 = vector.load %arg1[%c0, %c0_0] : memref<8x32xf32, #tpu.memory_space<vmem>>, vector<8x32xf32>
    %c0_1 = arith.constant 0 : index
    %c0_2 = arith.constant 0 : index
    %1 = vector.load %arg3[%c0_1, %c0_2] : memref<32x16xf32, #tpu.memory_space<vmem>>, vector<32x16xf32>
    %cst = arith.constant dense<0.000000e+00> : vector<8x16xf32>
    %2 = tpu.matmul %0, %1, %cst {dimension_numbers = #tpu.dot_dimension_numbers<[1], [0], [0], [1], [0, 0, 1, 1], [], []>} : vector<8x32xf32>, vector<32x16xf32>, vector<8x16xf32> -> vector<8x16xf32>
    %c0_3 = arith.constant 0 : index
    %c0_4 = arith.constant 0 : index
    %3 = vector.load %arg4[%c0_3, %c0_4] : memref<1x16xf32, #tpu.memory_space<vmem>>, vector<1x16xf32>
    %4 = vector.broadcast %3 : vector<1x16xf32> to vector<8x16xf32>
    %5 = arith.addf %2, %4 : vector<8x16xf32>
    %cst_5 = arith.constant 0.000000e+00 : f32
    %6 = vector.broadcast %cst_5 : f32 to vector<8x16xf32>
    %7 = arith.maximumf %5, %6 : vector<8x16xf32>
    %c0_6 = arith.constant 0 : index
    %c0_7 = arith.constant 0 : index
    %8 = vector.load %arg5[%c0_6, %c0_7] : memref<16x8xf32, #tpu.memory_space<vmem>>, vector<16x8xf32>
    %cst_8 = arith.constant dense<0.000000e+00> : vector<8x8xf32>
    %9 = tpu.matmul %7, %8, %cst_8 {dimension_numbers = #tpu.dot_dimension_numbers<[1], [0], [0], [1], [0, 0, 1, 1], [], []>} : vector<8x16xf32>, vector<16x8xf32>, vector<8x8xf32> -> vector<8x8xf32>
    %c0_9 = arith.constant 0 : index
    %c0_10 = arith.constant 0 : index
    %10 = vector.load %arg6[%c0_9, %c0_10] : memref<1x8xf32, #tpu.memory_space<vmem>>, vector<1x8xf32>
    %11 = vector.broadcast %10 : vector<1x8xf32> to vector<8x8xf32>
    %12 = arith.addf %9, %11 : vector<8x8xf32>
    %cst_11 = arith.constant 0.000000e+00 : f32
    %13 = vector.broadcast %cst_11 : f32 to vector<8x8xf32>
    %14 = arith.maximumf %12, %13 : vector<8x8xf32>
    %c0_12 = arith.constant 0 : index
    %c0_13 = arith.constant 0 : index
    %15 = vector.load %arg7[%c0_12, %c0_13] : memref<8x16xf32, #tpu.memory_space<vmem>>, vector<8x16xf32>
    %cst_14 = arith.constant dense<0.000000e+00> : vector<8x16xf32>
    %16 = tpu.matmul %14, %15, %cst_14 {dimension_numbers = #tpu.dot_dimension_numbers<[1], [0], [0], [1], [0, 0, 1, 1], [], []>} : vector<8x8xf32>, vector<8x16xf32>, vector<8x16xf32> -> vector<8x16xf32>
    %c0_15 = arith.constant 0 : index
    %c0_16 = arith.constant 0 : index
    %17 = vector.load %arg8[%c0_15, %c0_16] : memref<1x16xf32, #tpu.memory_space<vmem>>, vector<1x16xf32>
    %18 = vector.broadcast %17 : vector<1x16xf32> to vector<8x16xf32>
    %19 = arith.addf %16, %18 : vector<8x16xf32>
    %c0_17 = arith.constant 0 : index
    %c0_18 = arith.constant 0 : index
    %20 = vector.load %arg16[%c0_17, %c0_18] : memref<8x16xf32, #tpu.memory_space<vmem>>, vector<8x16xf32>
    tpu.vector_store %arg16[%c0_17, %c0_18], %19 {strides = array<i32>} : memref<8x16xf32, #tpu.memory_space<vmem>>, vector<8x16xf32>,
    %21 = vector.extract_strided_slice %19 {offsets = [0, 0], sizes = [8, 8], strides = [1, 1]} : vector<8x16xf32> to vector<8x8xf32>
    %22 = vector.extract_strided_slice %19 {offsets = [0, 8], sizes = [8, 8], strides = [1, 1]} : vector<8x16xf32> to vector<8x8xf32>
    %cst_19 = arith.constant 5.000000e-01 : f32
    %23 = vector.broadcast %cst_19 : f32 to vector<8x8xf32>
    %24 = arith.mulf %23, %22 : vector<8x8xf32>
    %25 = math.exp %24 : vector<8x8xf32>
    %c0_20 = arith.constant 0 : index
    %c0_21 = arith.constant 0 : index
    %26 = vector.load %arg2[%c0_20, %c0_21] : memref<8x8xf32, #tpu.memory_space<vmem>>, vector<8x8xf32>
    %27 = arith.mulf %26, %25 : vector<8x8xf32>
    %28 = arith.addf %21, %27 : vector<8x8xf32>
    %c0_22 = arith.constant 0 : index
    %c0_23 = arith.constant 0 : index
    %29 = vector.load %arg9[%c0_22, %c0_23] : memref<8x8xf32, #tpu.memory_space<vmem>>, vector<8x8xf32>
    %cst_24 = arith.constant dense<0.000000e+00> : vector<8x8xf32>
    %30 = tpu.matmul %28, %29, %cst_24 {dimension_numbers = #tpu.dot_dimension_numbers<[1], [0], [0], [1], [0, 0, 1, 1], [], []>} : vector<8x8xf32>, vector<8x8xf32>, vector<8x8xf32> -> vector<8x8xf32>
    %c0_25 = arith.constant 0 : index
    %c0_26 = arith.constant 0 : index
    %31 = vector.load %arg10[%c0_25, %c0_26] : memref<1x8xf32, #tpu.memory_space<vmem>>, vector<1x8xf32>
    %32 = vector.broadcast %31 : vector<1x8xf32> to vector<8x8xf32>
    %33 = arith.addf %30, %32 : vector<8x8xf32>
    %cst_27 = arith.constant 0.000000e+00 : f32
    %34 = vector.broadcast %cst_27 : f32 to vector<8x8xf32>
    %35 = arith.maximumf %33, %34 : vector<8x8xf32>
    %c0_28 = arith.constant 0 : index
    %c0_29 = arith.constant 0 : index
    %36 = vector.load %arg11[%c0_28, %c0_29] : memref<8x16xf32, #tpu.memory_space<vmem>>, vector<8x16xf32>
    %cst_30 = arith.constant dense<0.000000e+00> : vector<8x16xf32>
    %37 = tpu.matmul %35, %36, %cst_30 {dimension_numbers = #tpu.dot_dimension_numbers<[1], [0], [0], [1], [0, 0, 1, 1], [], []>} : vector<8x8xf32>, vector<8x16xf32>, vector<8x16xf32> -> vector<8x16xf32>
    %c0_31 = arith.constant 0 : index
    %c0_32 = arith.constant 0 : index
    %38 = vector.load %arg12[%c0_31, %c0_32] : memref<1x16xf32, #tpu.memory_space<vmem>>, vector<1x16xf32>
    %39 = vector.broadcast %38 : vector<1x16xf32> to vector<8x16xf32>
    %40 = arith.addf %37, %39 : vector<8x16xf32>
    %cst_33 = arith.constant 0.000000e+00 : f32
    %41 = vector.broadcast %cst_33 : f32 to vector<8x16xf32>
    %42 = arith.maximumf %40, %41 : vector<8x16xf32>
    %c0_34 = arith.constant 0 : index
    %c0_35 = arith.constant 0 : index
    %43 = vector.load %arg13[%c0_34, %c0_35] : memref<16x32xf32, #tpu.memory_space<vmem>>, vector<16x32xf32>
    %cst_36 = arith.constant dense<0.000000e+00> : vector<8x32xf32>
    %44 = tpu.matmul %42, %43, %cst_36 {dimension_numbers = #tpu.dot_dimension_numbers<[1], [0], [0], [1], [0, 0, 1, 1], [], []>} : vector<8x16xf32>, vector<16x32xf32>, vector<8x32xf32> -> vector<8x32xf32>
    %c0_37 = arith.constant 0 : index
    %c0_38 = arith.constant 0 : index
    %45 = vector.load %arg14[%c0_37, %c0_38] : memref<1x32xf32, #tpu.memory_space<vmem>>, vector<1x32xf32>
    %46 = vector.broadcast %45 : vector<1x32xf32> to vector<8x32xf32>
    %47 = arith.addf %44, %46 : vector<8x32xf32>
    %48 = arith.negf %47 : vector<8x32xf32>
    %49 = math.exp %48 : vector<8x32xf32>
    %cst_39 = arith.constant 1.000000e+00 : f32
    %50 = vector.broadcast %cst_39 : f32 to vector<8x32xf32>
    %51 = arith.addf %50, %49 : vector<8x32xf32>
    %52 = arith.divf %50, %51 : vector<8x32xf32>
    %c0_40 = arith.constant 0 : index
    %c0_41 = arith.constant 0 : index
    %53 = vector.load %arg15[%c0_40, %c0_41] : memref<8x32xf32, #tpu.memory_space<vmem>>, vector<8x32xf32>
    tpu.vector_store %arg15[%c0_40, %c0_41], %52 {strides = array<i32>} : memref<8x32xf32, #tpu.memory_space<vmem>>, vector<8x32xf32>,
    return
  }
  func.func @transform_0(%arg0: i32) -> (i32, i32) {
    %c0_i32 = arith.constant 0 : i32
    %c0_i32_0 = arith.constant 0 : i32
    return %arg0, %c0_i32 : i32, i32
  }
  func.func @transform_1(%arg0: i32) -> (i32, i32) {
    %c0_i32 = arith.constant 0 : i32
    %c0_i32_0 = arith.constant 0 : i32
    return %arg0, %c0_i32 : i32, i32
  }
  func.func @transform_2(%arg0: i32) -> (i32, i32) {
    %c0_i32 = arith.constant 0 : i32
    %c0_i32_0 = arith.constant 0 : i32
    %c0_i32_1 = arith.constant 0 : i32
    return %c0_i32, %c0_i32_0 : i32, i32
  }
  func.func @transform_3(%arg0: i32) -> (i32, i32) {
    %c0_i32 = arith.constant 0 : i32
    %c0_i32_0 = arith.constant 0 : i32
    %c0_i32_1 = arith.constant 0 : i32
    return %c0_i32, %c0_i32_0 : i32, i32
  }
  func.func @transform_4(%arg0: i32) -> (i32, i32) {
    %c0_i32 = arith.constant 0 : i32
    %c0_i32_0 = arith.constant 0 : i32
    %c0_i32_1 = arith.constant 0 : i32
    return %c0_i32, %c0_i32_0 : i32, i32
  }
  func.func @transform_5(%arg0: i32) -> (i32, i32) {
    %c0_i32 = arith.constant 0 : i32
    %c0_i32_0 = arith.constant 0 : i32
    %c0_i32_1 = arith.constant 0 : i32
    return %c0_i32, %c0_i32_0 : i32, i32
  }
  func.func @transform_6(%arg0: i32) -> (i32, i32) {
    %c0_i32 = arith.constant 0 : i32
    %c0_i32_0 = arith.constant 0 : i32
    %c0_i32_1 = arith.constant 0 : i32
    return %c0_i32, %c0_i32_0 : i32, i32
  }
  func.func @transform_7(%arg0: i32) -> (i32, i32) {
    %c0_i32 = arith.constant 0 : i32
    %c0_i32_0 = arith.constant 0 : i32
    %c0_i32_1 = arith.constant 0 : i32
    return %c0_i32, %c0_i32_0 : i32, i32
  }
  func.func @transform_8(%arg0: i32) -> (i32, i32) {
    %c0_i32 = arith.constant 0 : i32
    %c0_i32_0 = arith.constant 0 : i32
    %c0_i32_1 = arith.constant 0 : i32
    return %c0_i32, %c0_i32_0 : i32, i32
  }
  func.func @transform_9(%arg0: i32) -> (i32, i32) {
    %c0_i32 = arith.constant 0 : i32
    %c0_i32_0 = arith.constant 0 : i32
    %c0_i32_1 = arith.constant 0 : i32
    return %c0_i32, %c0_i32_0 : i32, i32
  }
  func.func @transform_10(%arg0: i32) -> (i32, i32) {
    %c0_i32 = arith.constant 0 : i32
    %c0_i32_0 = arith.constant 0 : i32
    %c0_i32_1 = arith.constant 0 : i32
    return %c0_i32, %c0_i32_0 : i32, i32
  }
  func.func @transform_11(%arg0: i32) -> (i32, i32) {
    %c0_i32 = arith.constant 0 : i32
    %c0_i32_0 = arith.constant 0 : i32
    %c0_i32_1 = arith.constant 0 : i32
    return %c0_i32, %c0_i32_0 : i32, i32
  }
  func.func @transform_12(%arg0: i32) -> (i32, i32) {
    %c0_i32 = arith.constant 0 : i32
    %c0_i32_0 = arith.constant 0 : i32
    %c0_i32_1 = arith.constant 0 : i32
    return %c0_i32, %c0_i32_0 : i32, i32
  }
  func.func @transform_13(%arg0: i32) -> (i32, i32) {
    %c0_i32 = arith.constant 0 : i32
    %c0_i32_0 = arith.constant 0 : i32
    %c0_i32_1 = arith.constant 0 : i32
    return %c0_i32, %c0_i32_0 : i32, i32
  }
  func.func @transform_14(%arg0: i32) -> (i32, i32) {
    %c0_i32 = arith.constant 0 : i32
    %c0_i32_0 = arith.constant 0 : i32
    return %arg0, %c0_i32 : i32, i32
  }
  func.func @transform_15(%arg0: i32) -> (i32, i32) {
    %c0_i32 = arith.constant 0 : i32
    %c0_i32_0 = arith.constant 0 : i32
    return %arg0, %c0_i32 : i32, i32
  }
}

</mosaic_0001>

<bundles_post_ra>
// kernel: vae_forward.1
= control target key start
LH: loop header
LB: loop body
LE: loop exit
PB: predicated region body
PF: predicated region fallthrough
CT: control target
= control target key end

     0   :  { %v702_v3 = vmov 0.0|0.0   ;;  %vm703_vm0 = vmmov 0   ;;  %v704_v6 = vmov 0.0   ;;  %s873_s0 = inlined_call_operand.vmem [shape: f32[8,32], index: 0, kind: input, shape index: {}]   ;;  %s874_s1 = inlined_call_operand.vmem [shape: f32[8,8], index: 1, kind: input, shape index: {}]   ;;  %s875_s2 = inlined_call_operand.vmem [shape: f32[32,16], index: 2, kind: input, shape index: {}]   ;;  %s876_s3 = inlined_call_operand.vmem [shape: f32[1,16], index: 3, kind: input, shape index: {}]   ;;  %s877_s4 = inlined_call_operand.vmem [shape: f32[16,8], index: 4, kind: input, shape index: {}]   ;;  %s878_s5 = inlined_call_operand.vmem [shape: f32[1,8], index: 5, kind: input, shape index: {}]   ;;  %s879_s6 = inlined_call_operand.vmem [shape: f32[8,16], index: 6, kind: input, shape index: {}]   ;;  %s880_s7 = inlined_call_operand.vmem [shape: f32[1,16], index: 7, kind: input, shape index: {}]   ;;  %s881_s8 = inlined_call_operand.vmem [shape: f32[8,8], index: 8, kind: input, shape index: {}]   ;;  %s882_s9 = inlined_call_operand.vmem [shape: f32[1,8], index: 9, kind: input, shape index: {}]   ;;  %s883_s10 = inlined_call_operand.vmem [shape: f32[8,16], index: 10, kind: input, shape index: {}]   ;;  %s884_s11 = inlined_call_operand.vmem [shape: f32[1,16], index: 11, kind: input, shape index: {}]   ;;  %s885_s12 = inlined_call_operand.vmem [shape: f32[16,32], index: 12, kind: input, shape index: {}]   ;;  %s886_s13 = inlined_call_operand.vmem [shape: f32[1,32], index: 13, kind: input, shape index: {}]   ;;  %s887_s14 = inlined_call_operand.hbm [shape: f32[8,32], index: 14, kind: output, shape index: {0}]   ;;  %s888_s15 = inlined_call_operand.vmem [shape: f32[8,16], index: 15, kind: output, shape index: {1}]  }
   0x1   :  { %v51_v0 = vld [vmem:[%s875_s2] sm:$0xff]  ;;  %v52_v1 = vld [vmem:[%s875_s2 + $0x8] sm:$0xff]  ;;  %v53_v2 = vld [vmem:[%s875_s2 + $0x10] sm:$0xff]  ;;  %655 = vmatprep.subr.bf16.mxu0 %v702_v3  ;;  %623 = vmatprep.mubr.msk.f32.mxu0 %vm703_vm0, %v704_v6 }
   0x2   :  { %v656_v4 = vpack.c.bf16 %v52_v1, %v51_v0  ;;  %v54_v5 = vld [vmem:[%s875_s2 + $0x18] sm:$0xff]  ;;  %661 = vmatprep.subr.bf16.mxu1 %v702_v3  ;;  %630 = vmatprep.mubr.msk.f32.mxu1 %vm703_vm0, %v704_v6 }
   0x3   :  { %21 = vsyncpa [#allocation3], 0  ;;  %v659_v7 = vpack.c.bf16 %v54_v5, %v53_v2  ;;  %v50_v8 = vld [vmem:[%s873_s0] sm:$0xff]  ;;  %vm62_vm1 = vcmask 261120   ;;  %v138_v10 = vld [vmem:[%s877_s4 + $0x8] sm:$0xff]  ;;  %vm146_vm2 = vcmask 130048  }
   0x4   :  { %657 = vmatpush3.bf16.msra.mxu0 %v656_v4  ;;  %v137_v9 = vld [vmem:[%s877_s4] sm:$0xff]  ;;  %vm229_vm3 = vcmask 64512   ;;  %s705_s23 = smov 120   ;;  %v479_v42 = vld [vmem:[%s885_s12 + $0x8] sm:$0xff] }
   0x5   :  { %658 = vmatprep.subr.bf16.mxu0 %v702_v3  ;;  %v662_v11 = vpack.c.bf16 %v138_v10, %v137_v9  ;;  %v585_v12 = vld [vmem:[%s876_s3] ss:$0 sm:$0xff] }
   0x6   :  { %v221_v17 = vld [vmem:[%s879_s6] sm:$0xff] }
   0x7   :  { %663 = vmatpush3.bf16.msra.mxu1 %v662_v11  ;;  %v587_v18 = vld [vmem:[%s878_s5] ss:$0 sm:$0xff] }
   0x8   :  { %660 = vmatpush3.bf16.msra.mxu0 %v659_v7  ;;  %633 = vmatprep.subr.mxu1 %v704_v6  ;;  %v589_v23 = vld [vmem:[%s880_s7] ss:$0 sm:$0xff] }
   0x9   :  { %638 = vmatprep.subr.mxu0 %v704_v6  ;;  %v314_v29 = vld [vmem:[%s881_s8] sm:$0xff] }
   0xa   :  { %v307_v31 = vld [vmem:[%s874_s1] sm:$0xff] }
   0xb   :  { %624 = vmatmul.mubr.msk.f32.vlgmr.msra.gmra.mrb[0].mxu0 %vm62_vm1, %v50_v8  ;;  %v396_v35 = vld [vmem:[%s883_s10] sm:$0xff] }
   0xc   :  { %640 = vmatprep.mubr.msk.f32.mxu0 %vm703_vm0, %v704_v6  ;;  %639 = vmatpush3.msra.mxu0 %v314_v29  ;;  %v591_v36 = vld [vmem:[%s882_s9] ss:$0 sm:$0xff] }
   0xd   :  { %664 = vmatprep.subr.bf16.mxu0 %v702_v3  ;;  %v478_v41 = vld [vmem:[%s885_s12] sm:$0xff]  ;;  %s706_s12 = smov [#allocation2]  }
   0xe   :  { %v665_v43 = vpack.c.bf16 %v479_v42, %v478_v41  ;;  %v593_v44 = vld [vmem:[%s884_s11] ss:$0 sm:$0xff]  ;;  %s573_s11 = sshll.u32 %s706_s12, 4  ;;  %s574_s11 = int_to_ptr.vmem [resolvable:$true] %s573_s11 }
   0xf   :  { %v595_v49 = vld [vmem:[%s886_s13] ss:$0 sm:$0xff]  ;;  %s678_s16 = scalar_lea.vmem %s574_s11, 128  ;;  %p683_p1 = scmp.lt.s32.totalorder %s574_s11, %s574_s11 }
  0x10   :  { %p679_p0 = scmp.ne.s32.totalorder %s574_s11, %s678_s16  ;;  %p684_p2 = scmp.lt.s32.totalorder %s678_s16, %s678_s16 }
  0x12   :  { %p685_p3 = por %p684_p2, %p683_p1 }
  0x14   :  { %p686_p4 = pnand %p685_p3, %p679_p0 }
  0xde   :  { %v132_v13 = vpop.f32.mrb[0].mxu0 }
  0xdf   :  { %v133_v14 = vadd.f32 %v585_v12, %v132_v13  ;;  %v625_v15 = vpop.f32.mrb[1].mxu0 }
  0xe1   :  { %v136_v16 = vmax.f32 %v133_v14, 0.0 }
  0xe3   :  { %631 = vmatmul.mubr.msk.f32.vlgmr.msra.gmra.mrb[0].mxu1 %vm146_vm2, %v136_v16 }
  0xe4   :  { %635 = vmatprep.mubr.msk.f32.mxu1 %vm703_vm0, %v704_v6  ;;  %634 = vmatpush3.msra.mxu1 %v221_v17 }
  0xe5   :  { %643 = vmatprep.subr.mxu1 %v704_v6 }
 0x1b6   :  { %v216_v19 = vpop.f32.mrb[0].mxu1 }
 0x1b7   :  { %v217_v20 = vadd.f32 %v587_v18, %v216_v19  ;;  %v632_v21 = vpop.f32.mrb[1].mxu1 }
 0x1b9   :  { %v220_v22 = vmax.f32 %v217_v20, 0.0 }
 0x1bb   :  { %636 = vmatmul.mubr.msk.f32.vlgmr.msra.gmra.mrb[2].mxu1 %vm229_vm3, %v220_v22 }
 0x1bc   :  { %645 = vmatprep.mubr.msk.f32.mxu1 %vm703_vm0, %v704_v6  ;;  %644 = vmatpush3.msra.mxu1 %v396_v35 }
 0x28e   :  { %v299_v24 = vpop.f32.mrb[2].mxu1 }
 0x28f   :  { %v300_v25 = vadd.f32 %v589_v23, %v299_v24  ;;  %v637_v26 = vpop.f32.mrb[3].mxu1 }
 0x291   :  { %303 = vst.msk [vmem:[%s888_s15] sm:$0xff] %vm146_vm2, %v300_v25  ;;  %v304_v27 = vmul.f32 0.5, %v300_v25 }
 0x293   :  { %v305_v28 = vmul.f32 1.442695, %v304_v27 }
 0x295   :  { %672 = vpow2.f32 %v305_v28 }
 0x29f   :  { %v673_v30 = vpop.eup %672 }
 0x2a0   :  { %309 = vrot.lane.b32.xlu0 %v673_v30, %s705_s23 }
 0x312   :  { %v310_v32 = vpop.permute.xlu0 %309 }
 0x313   :  { %v312_v33 = vmul.f32 %v310_v32, %v307_v31 }
 0x315   :  { %v313_v34 = vadd.f32 %v312_v33, %v300_v25 }
 0x317   :  { %641 = vmatmul.mubr.msk.f32.vlgmr.msra.gmra.mrb[2].mxu0 %vm229_vm3, %v313_v34 }
 0x318   :  { %652 = vmatprep.mubr.msk.f32.mxu0 %vm703_vm0, %v704_v6  ;;  %666 = vmatpush3.bf16.msra.mxu0 %v665_v43 }
 0x3ea   :  { %v391_v37 = vpop.f32.mrb[2].mxu0 }
 0x3eb   :  { %v392_v38 = vadd.f32 %v591_v36, %v391_v37  ;;  %v642_v39 = vpop.f32.mrb[3].mxu0 }
 0x3ed   :  { %v395_v40 = vmax.f32 %v392_v38, 0.0 }
 0x3ef   :  { %646 = vmatmul.mubr.msk.f32.vlgmr.msra.gmra.mrb[4].mxu1 %vm229_vm3, %v395_v40 }
 0x4c2   :  { %v473_v45 = vpop.f32.mrb[4].mxu1 }
 0x4c3   :  { %v474_v46 = vadd.f32 %v593_v44, %v473_v45  ;;  %v647_v47 = vpop.f32.mrb[5].mxu1 }
 0x4c5   :  { %v477_v48 = vmax.f32 %v474_v46, 0.0 }
 0x4c7   :  { %653 = vmatmul.mubr.msk.f32.vlgmr.msra.gmra.mrb[4].mxu0 %vm146_vm2, %v477_v48 }
 0x59a   :  { %v556_v50 = vpop.f32.mrb[4].mxu0 }
 0x59b   :  { %v557_v51 = vadd.f32 %v595_v49, %v556_v50  ;;  %v654_v52 = vpop.f32.mrb[5].mxu0 }
 0x59d   :  { %v597_v53 = vmul.f32 -1.442695, %v557_v51 }
 0x59f   :  { %674 = vpow2.f32 %v597_v53 }
 0x5a9   :  { %v675_v54 = vpop.eup %674 }
 0x5aa   :  { %v563_v55 = vadd.f32 1.0, %v675_v54 }
 0x5ac   :  { %676 = vrcp.f32 %v563_v55 }
 0x5b6   :  { %v677_v56 = vpop.eup %676 }
 0x5b7   :  { %566 = vst.msk [vmem:[#allocation2] sm:$0xff] %vm62_vm1, %v677_v56 }
 0x5b8   :  { %689 = shalt.err (!%p686_p4)
}
 0x5b9   :  { %s690_s0 = scalar_lea.hbm %s887_s14, 128 }
 0x5ba   :  { %p691_p5 = scmp.ne.s32.totalorder %s887_s14, %s690_s0  ;;  %p694_p6 = scmp.lt.u32.totalorder %s690_s0, %s887_s14 }
 0x5bc   :  { %p696_p7 = pnand %p694_p6, %p691_p5 }
 0x5be   :  { %699 = shalt.err (!%p696_p7)
}
 0x5bf   :  { %576 = dma.vmem_to_hbm [thread:$0]  %s574_s11, 128, %s887_s14, [#allocation3]  }
 0x5c0   :  { %700 = dma.done.wait [#allocation3], 128  }
 0x5c1   :  { %701 = vsyncadd [#allocation3], 4294967168 }
 0x5c2   :  { %584 = vsyncpa [#allocation3], 1 }

</bundles_post_ra>
